<compile_context>
chip_gen: v5e
topology: v5e:2x2
jax: 0.10.0
libtpu: 0.0.40
codegen_flags: <defaults>
</compile_context>

<pallas_src>
import functools
import math

import numpy as np

import jax
import jax.numpy as jnp
from jax.experimental import pallas as pl
from jax.experimental.pallas import tpu as pltpu


_LOW = 20.0
_HIGH = 60.0
_SMALL_BYTES = 256 * 1024          # below this, use the fused-XLA fallback
_PAD_VALUE = 40.0                  # inside [20, 60]; equal pad for pred/target
                                   # -> padded elements contribute exactly 0.


def _per_input_block_bytes():
    """Per-input, per-step VMEM block budget, gated by TPU generation."""
    try:
        kind = jax.devices()[0].device_kind.lower()
    except Exception:  # pragma: no cover - backend probing should not fail
        kind = ""
    if "v7" in kind or "7x" in kind:
        # v7x: fastest HBM -> needs the most bytes/step to hide ~0.35us step
        # overhead, but smallest VMEM (32 MiB scoped): 4 MiB/input -> 16 MiB
        # total double-buffered, still under the default scoped limit.
        return 4 * 1024 * 1024
    if "v6" in kind:
        return 2 * 1024 * 1024
    # v5e (16 MiB scoped default) and unknown backends.
    return (3 * 1024 * 1024) // 2


def _choose_layout(n, d):
    """Pick lane width C (multiple of 128 and of D) for the flat (R, C) view.

    Returns (c, n_padded, needs_pad).  Prefers a C that divides N exactly so
    the wrapper never has to materialize a padded copy.
    """
    c_unit = (128 * d) // math.gcd(128, d)
    pref = max(c_unit, ((512 + c_unit - 1) // c_unit) * c_unit)
    m_hi = max(1, min(n // c_unit, (2 * pref) // c_unit))
    for m in range(m_hi, 0, -1):
        cand = c_unit * m
        if n % cand == 0:
            return cand, n, False
    c = pref
    n_pad = ((n + c - 1) // c) * c
    return c, n_pad, True


def _choose_block_rows(rows, lanes, itemsize, override):
    """Pick the row-tile TR.  Returns (tr, ragged_last_tile)."""
    if override is not None:
        cap = max(1, int(override))
    else:
        cap = max(8, _per_input_block_bytes() // (lanes * itemsize))
    if rows <= cap:
        return rows, False                      # single full-extent block
    cap = max(8, (cap // 8) * 8)
    # Prefer a tile that divides R so no per-step mask is ever emitted.
    t = cap
    floor_t = max(8, ((cap // 2) // 8) * 8)
    while t >= floor_t:
        if rows % t == 0:
            return t, False
        t -= 8
    return cap, True                            # ragged; kernel masks rows


def _weighted_mse_kernel(*refs, d, factor, rows_total, block_rows, ragged):
    if d > 1:
        pos_ref, pred_ref, targ_ref, out_ref = refs
    else:
        pred_ref, targ_ref, out_ref = refs

    pred = pred_ref[...].astype(jnp.float32)           # (block_rows, C)
    targ = targ_ref[...].astype(jnp.float32)           # (block_rows, C)

    if d == 1:
        # Every element IS target[:, 0].
        t_first = targ
    else:
        # Rows are laid out contiguously along lanes (C % D == 0); the row's
        # first target value for a lane with pos == k sits k lanes to the
        # left, fetched with an XLU lane-roll (idle unit here).
        pos = pos_ref[...]                              # (1, C) int32 = lane % D
        t_first = jnp.where(pos == 0, targ, 0.0)
        for k in range(1, d):
            t_first = t_first + jnp.where(pos == k,
                                          pltpu.roll(targ, k, axis=1), 0.0)

    w = jnp.where((t_first < _LOW) | (t_first > _HIGH),
                  jnp.float32(factor), jnp.float32(1.0))
    diff = pred - targ
    wsq = w * (diff * diff)

    if ragged:
        # Emitted only when TR does not divide R: zero the rows of the last
        # block that lie past the array (Pallas block padding is garbage).
        row = jax.lax.broadcasted_iota(jnp.int32, (block_rows, 1), 0)
        valid = (pl.program_id(0) * block_rows + row) < rows_total
        wsq = jnp.where(valid, wsq, 0.0)

    # Per-step partial sum: sublane reduce (VPU adds + one small XLU pass per
    # lane tile), then lane reduce.  Each step owns its output block, so there
    # is no cross-step scalar dependency and the grid axis stays "parallel".
    col = jnp.sum(wsq, axis=0, keepdims=True)           # (1, C)
    part = jnp.sum(col, axis=1, keepdims=True)          # (1, 1)
    lane = jax.lax.broadcasted_iota(jnp.int32, (1, 128), 1)
    out_ref[...] = jnp.where(lane == 0, part, 0.0)


def _weighted_mse_jnp(predicted, target, factor):
    """Fused-XLA fallback / reference, matching the PyTorch forward."""
    p = jnp.asarray(predicted, jnp.float32)
    t = jnp.asarray(target, jnp.float32)
    w = jnp.where((t[:, 0:1] < _LOW) | (t[:, 0:1] > _HIGH),
                  jnp.float32(factor), jnp.float32(1.0))
    return jnp.mean(w * (p - t) ** 2)


def weighted_mse_loss(predicted, target, factor=2.0, *,
                      block_rows=None, force_pallas=False):
    """Pallas TPU equivalent of WeightedMSELoss.forward.

    predicted, target: matching (B, D) arrays (any float dtype).
    Returns a float32 scalar loss.
    """
    predicted = jnp.asarray(predicted)
    target = jnp.asarray(target)
    assert predicted.ndim == 2 and predicted.shape == target.shape, (
        "expected matching 2-D (batch, features) inputs")

    b, d = predicted.shape
    n = b * d
    itemsize = max(jnp.dtype(predicted.dtype).itemsize,
                   jnp.dtype(target.dtype).itemsize)

    if d > 8:
        # TODO(synk): in-kernel row-first weight propagation is only
        # implemented for D <= 8; wide-feature targets use the fused XLA path.
        return _weighted_mse_jnp(predicted, target, factor)
    if not force_pallas and 2 * n * itemsize < _SMALL_BYTES:
        # Kernel-launch overhead dominates at these sizes.
        return _weighted_mse_jnp(predicted, target, factor)

    # ---- dense (R, C) layout, row-major flatten (free reshape) -------------
    c, n_pad, needs_pad = _choose_layout(n, d)
    pred_flat = predicted.reshape(-1)
    targ_flat = target.reshape(-1)
    if needs_pad:
        pad = n_pad - n
        pred_flat = jnp.pad(pred_flat, (0, pad), constant_values=_PAD_VALUE)
        targ_flat = jnp.pad(targ_flat, (0, pad), constant_values=_PAD_VALUE)
    rows = n_pad // c
    pred2 = pred_flat.reshape(rows, c)
    targ2 = targ_flat.reshape(rows, c)

    tr, ragged = _choose_block_rows(rows, c, itemsize, block_rows)
    nb = pl.cdiv(rows, tr)

    kernel = functools.partial(
        _weighted_mse_kernel, d=d, factor=float(factor),
        rows_total=rows, block_rows=tr, ragged=ragged)

    in_specs = [pl.BlockSpec((tr, c), lambda i: (i, 0)),
                pl.BlockSpec((tr, c), lambda i: (i, 0))]
    args = [pred2, targ2]
    if d > 1:
        pos = jnp.asarray(np.arange(c, dtype=np.int32) % d).reshape(1, c)
        in_specs = [pl.BlockSpec((1, c), lambda i: (0, 0))] + in_specs
        args = [pos] + args

    partials = pl.pallas_call(
        kernel,
        out_shape=jax.ShapeDtypeStruct((1, nb * 128), jnp.float32),
        grid_spec=pltpu.PrefetchScalarGridSpec(
            num_scalar_prefetch=0,
            grid=(nb,),
            in_specs=in_specs,
            out_specs=pl.BlockSpec((1, 128), lambda i: (0, i)),
        ),
        compiler_params=pltpu.CompilerParams(
            dimension_semantics=("parallel",)),
    )(*args)

    # Padded elements contributed exactly 0; divide by the true element count.
    return jnp.sum(partials) * jnp.float32(1.0 / n)


if __name__ == "__main__":
    key = jax.random.PRNGKey(0)
    factor = 2.0
    ks = jax.random.split(key, 12)

    def _check(name, p, t, **kw):
        loss = weighted_mse_loss(p, t, factor, force_pallas=True, **kw)
        jax.block_until_ready(loss)
        ref = _weighted_mse_jnp(p, t, factor)
        assert jnp.allclose(loss, ref, rtol=1e-4, atol=1e-5), (name, loss, ref)

    # 1) single dense block, D == 1.
    t1 = jax.random.uniform(ks[0], (512, 1), jnp.float32, 0.0, 80.0)
    p1 = t1 + jax.random.normal(ks[1], (512, 1), jnp.float32)
    _check("single_block", p1, t1)

    # 2) multi-step "parallel" grid with a divisor row tiling (no mask).
    t2 = jax.random.uniform(ks[2], (32768, 1), jnp.float32, 0.0, 80.0)
    p2 = t2 + jax.random.normal(ks[3], (32768, 1), jnp.float32)
    _check("multi_tile", p2, t2, block_rows=16)

    # 3) ragged row tiling (last-block row mask path).
    t3 = jax.random.uniform(ks[4], (10240, 1), jnp.float32, 0.0, 80.0)
    p3 = t3 + jax.random.normal(ks[5], (10240, 1), jnp.float32)
    _check("ragged_rows", p3, t3, block_rows=8)

    # 4) D = 2 with N not a multiple of 128 (pad path + in-kernel roll).
    t4 = jax.random.uniform(ks[6], (300, 2), jnp.float32, 0.0, 80.0)
    p4 = t4 + jax.random.normal(ks[7], (300, 2), jnp.float32)
    _check("d2_padded", p4, t4)

    # 5) D = 4, clean divide (in-kernel roll, no pad).
    t5 = jax.random.uniform(ks[8], (2048, 4), jnp.float32, 0.0, 80.0)
    p5 = t5 + jax.random.normal(ks[9], (2048, 4), jnp.float32)
    _check("d4", p5, t5)

    # 6) bf16 inputs at native dtype (halved HBM traffic), f32 math in-kernel.
    t6 = jax.random.uniform(ks[10], (384, 1), jnp.float32, 0.0, 80.0).astype(jnp.bfloat16)
    p6 = (t6.astype(jnp.float32)
          + jax.random.normal(ks[11], (384, 1), jnp.float32)).astype(jnp.bfloat16)
    _check("bf16", p6, t6)

    # 7) small-input dispatch goes through the fused-XLA fallback.
    loss7 = weighted_mse_loss(p1, t1, factor)
    jax.block_until_ready(loss7)
    assert jnp.allclose(loss7, _weighted_mse_jnp(p1, t1, factor), rtol=1e-5)

    print("KERNEL_OK")
</pallas_src>

<mosaic_0001>
module attributes {stable_mosaic.version = 11 : i64} {
  func.func @_weighted_mse_kernel(%arg0: i32, %arg1: memref<1x512xf32, #tpu.memory_space<vmem>>, %arg2: memref<1x512xf32, #tpu.memory_space<vmem>>, %arg3: memref<1x128xf32, #tpu.memory_space<vmem>>) attributes {dimension_semantics = [#tpu.dimension_semantics<parallel>], iteration_bounds = array<i64: 1>, scalar_prefetch = 0 : i64, scratch_operands = 0 : i64, tpu.core_type = #tpu.core_type<tc>, window_params = [{transform_indices = @transform_0, window_bounds = array<i64: 1, 512>}, {transform_indices = @transform_1, window_bounds = array<i64: 1, 512>}, {transform_indices = @transform_2, window_bounds = array<i64: 1, 128>}]} {
    %c0 = arith.constant 0 : index
    %c0_0 = arith.constant 0 : index
    %0 = vector.load %arg1[%c0, %c0_0] : memref<1x512xf32, #tpu.memory_space<vmem>>, vector<1x512xf32>
    %c0_1 = arith.constant 0 : index
    %c0_2 = arith.constant 0 : index
    %1 = vector.load %arg2[%c0_1, %c0_2] : memref<1x512xf32, #tpu.memory_space<vmem>>, vector<1x512xf32>
    %cst = arith.constant 2.000000e+01 : f32
    %2 = vector.broadcast %cst : f32 to vector<1x512xf32>
    %3 = arith.cmpf olt, %1, %2 : vector<1x512xf32>
    %cst_3 = arith.constant 6.000000e+01 : f32
    %4 = vector.broadcast %cst_3 : f32 to vector<1x512xf32>
    %5 = arith.cmpf ogt, %1, %4 : vector<1x512xf32>
    %6 = arith.ori %3, %5 : vector<1x512xi1>
    %cst_4 = arith.constant 2.000000e+00 : f32
    %cst_5 = arith.constant 1.000000e+00 : f32
    %7 = vector.broadcast %cst_4 : f32 to vector<1x512xf32>
    %8 = vector.broadcast %cst_5 : f32 to vector<1x512xf32>
    %9 = arith.select %6, %7, %8 : vector<1x512xi1>, vector<1x512xf32>
    %10 = arith.subf %0, %1 : vector<1x512xf32>
    %11 = arith.mulf %10, %10 : vector<1x512xf32>
    %12 = arith.mulf %9, %11 : vector<1x512xf32>
    %cst_6 = arith.constant dense<0.000000e+00> : vector<512xf32>
    %13 = vector.multi_reduction <add>, %12, %cst_6 [0] : vector<1x512xf32> to vector<512xf32>
    %14 = vector.shape_cast %13 : vector<512xf32> to vector<1x512xf32>
    %cst_7 = arith.constant dense<0.000000e+00> : vector<1xf32>
    %15 = vector.multi_reduction <add>, %14, %cst_7 [1] : vector<1x512xf32> to vector<1xf32>
    %16 = vector.shape_cast %15 : vector<1xf32> to vector<1x1xf32>
    %17 = tpu.iota {dimensions = array<i32: 1>} : vector<1x128xi32>
    %c0_i32 = arith.constant 0 : i32
    %18 = vector.broadcast %c0_i32 : i32 to vector<1x128xi32>
    %19 = arith.cmpi eq, %17, %18 : vector<1x128xi32>
    %cst_8 = arith.constant 0.000000e+00 : f32
    %20 = vector.shape_cast %16 : vector<1x1xf32> to vector<1x1xf32>
    %21 = vector.broadcast %20 : vector<1x1xf32> to vector<1x128xf32>
    %22 = vector.broadcast %cst_8 : f32 to vector<1x128xf32>
    %23 = arith.select %19, %21, %22 : vector<1x128xi1>, vector<1x128xf32>
    %c0_9 = arith.constant 0 : index
    %c0_10 = arith.constant 0 : index
    %24 = vector.load %arg3[%c0_9, %c0_10] : memref<1x128xf32, #tpu.memory_space<vmem>>, vector<1x128xf32>
    tpu.vector_store %arg3[%c0_9, %c0_10], %23 {strides = array<i32>} : memref<1x128xf32, #tpu.memory_space<vmem>>, vector<1x128xf32>,
    return
  }
  func.func @transform_0(%arg0: i32) -> (i32, i32) {
    %c0_i32 = arith.constant 0 : i32
    %c0_i32_0 = arith.constant 0 : i32
    return %arg0, %c0_i32 : i32, i32
  }
  func.func @transform_1(%arg0: i32) -> (i32, i32) {
    %c0_i32 = arith.constant 0 : i32
    %c0_i32_0 = arith.constant 0 : i32
    return %arg0, %c0_i32 : i32, i32
  }
  func.func @transform_2(%arg0: i32) -> (i32, i32) {
    %c0_i32 = arith.constant 0 : i32
    %c0_i32_0 = arith.constant 0 : i32
    return %c0_i32, %arg0 : i32, i32
  }
}

</mosaic_0001>

<bundles_post_ra>
// kernel: tpu_custom_call.1
= control target key start
LH: loop header
LB: loop body
LE: loop exit
PB: predicated region body
PF: predicated region fallthrough
CT: control target
= control target key end

     0   :  { %7 = vsyncpa [#allocation3], 0  ;;  %s202_s0 = inlined_call_operand.hbm [shape: f32[1,512], index: 0, kind: input, shape index: {}]   ;;  %s203_s1 = inlined_call_operand.hbm [shape: f32[1,512], index: 1, kind: input, shape index: {}]   ;;  %s204_s2 = inlined_call_operand.hbm [shape: f32[1,128], index: 2, kind: output, shape index: {}]  }
   0x1   :  { %8 = vsyncpa [#allocation6], 0 }
   0x2   :  { %9 = vsyncpa [#allocation4], 0  ;;  %s15_s11 = sshll.u32 %s202_s0, 4  ;;  %s174_s12 = smov [#allocation2]   ;;  %s16_s11 = int_to_ptr.hbm [resolvable:$true] %s15_s11 }
   0x3   :  { %s17_s13 = sshll.u32 %s174_s12, 4  ;;  %s26_s16 = sshll.u32 %s203_s1, 4  ;;  %s18_s13 = int_to_ptr.vmem [resolvable:$true] %s17_s13  ;;  %s27_s16 = int_to_ptr.hbm [resolvable:$true] %s26_s16 }
   0x4   :  { %20 = dma.hbm_to_vmem [thread:$0]  %s16_s11, 64, %s18_s13, [#allocation3]  }
   0x5   :  { %s175_s17 = smov [#allocation5]  }
   0x6   :  { %s28_s18 = sshll.u32 %s175_s17, 4  ;;  %s29_s18 = int_to_ptr.vmem [resolvable:$true] %s28_s18 }
   0x7   :  { %31 = dma.hbm_to_vmem [thread:$0]  %s27_s16, 64, %s29_s18, [#allocation6]  }
   0x8   :  { %168 = dma.done.wait [#allocation3], 64  }
   0x9   :  { %169 = vsyncadd [#allocation3], 4294967232 }
   0xa   :  { %170 = dma.done.wait [#allocation6], 64  }
   0xb   :  { %171 = vsyncadd [#allocation6], 4294967232  ;;  %v40_v0 = vld [vmem:[#allocation2] sm:$0xf]  ;;  %v41_v1 = vld [vmem:[#allocation5] sm:$0xf]  ;;  %v69_v18 = vlaneseq }
   0xc   :  { %vm42_vm0 = vcmp.lt.f32.partialorder %v41_v1, 20.0  ;;  %vm43_vm1 = vcmp.gt.f32.partialorder %v41_v1, 60.0  ;;  %v46_v2 = vsub.f32 %v40_v0, %v41_v1  ;;  %v176_v3 = vmov 1.0   ;;  %s177_s0 = smov [#allocation7]   ;;  %s81_s21 = sshll.u32 %s204_s2, 4  ;;  %s82_s21 = int_to_ptr.hbm [resolvable:$true] %s81_s21 }
   0xd   :  { %vm44_vm2 = vmor %vm42_vm0, %vm43_vm1  ;;  %vm59_vm3 = vcmask 1040384   ;;  %v70_v19 = vand.u32 127, %v69_v18  ;;  %s79_s1 = sshll.u32 %s177_s0, 4  ;;  %s80_s1 = int_to_ptr.vmem [resolvable:$true] %s79_s1 }
   0xe   :  { %v45_v4 = vsel %vm44_vm2, 2.0, %v176_v3  ;;  %v47_v5 = vmul.f32 %v46_v2, %v46_v2 }
   0xf   :  { %vm71_vm4 = vcmp.eq.s32.totalorder %v70_v19, 0 }
  0x10   :  { %v48_v6 = vmul.f32 %v47_v5, %v45_v4 }
  0x12   :  { %v51_v7 = vperm.slane %v48_v6, 0  ;;  %v52_v8 = vperm.slane %v48_v6, 1  ;;  %v53_v9 = vperm.slane %v48_v6, 2  ;;  %v54_v10 = vperm.slane %v48_v6, 3 }
  0x14   :  { %v60_v11 = vsel %vm59_vm3, %v51_v7, 0.0  ;;  %v61_v12 = vsel %vm59_vm3, %v52_v8, 0.0  ;;  %v63_v13 = vsel %vm59_vm3, %v53_v9, 0.0  ;;  %v65_v15 = vsel %vm59_vm3, %v54_v10, 0.0 }
  0x15   :  { %v62_v14 = vadd.f32 %v61_v12, %v60_v11 }
  0x17   :  { %v64_v16 = vadd.f32 %v63_v13, %v62_v14 }
  0x19   :  { %v66_v17 = vadd.f32 %v65_v15, %v64_v16 }
  0x1b   :  { %67 = vadd.xlane.f32.xlu0 %v66_v17 }
  0x8e   :  { %v68_v20 = vpop.xlane.xlu0 %67 }
  0x8f   :  { %v72_v21 = vsel %vm71_vm4, %v68_v20, 0.0 }
  0x90   :  { %73 = vst [vmem:[#allocation7] sm:$0x1] %v72_v21 }
  0x91   :  { %84 = dma.vmem_to_hbm [thread:$0]  %s80_s1, 16, %s82_s21, [#allocation4]  }
  0x92   :  { %172 = dma.done.wait [#allocation4], 16  }
  0x93   :  { %173 = vsyncadd [#allocation4], 4294967280 }
  0x94   :  { %89 = vsyncpa [#allocation3], 1 }
  0x95   :  { %90 = vsyncpa [#allocation6], 1 }
  0x96   :  { %91 = vsyncpa [#allocation4], 1 }

</bundles_post_ra>
